<compile_context>
chip_gen: v5e
topology: v5e:2x2
jax: 0.10.0
libtpu: 0.0.40
codegen_flags: <defaults>
</compile_context>

<pallas_src>
from typing import NamedTuple

import jax
import jax.numpy as jnp
from jax.experimental import pallas as pl
from jax.experimental.pallas import tpu as pltpu


def _round_up(a, b):
    return ((a + b - 1) // b) * b


class IA3Params(NamedTuple):
    wT: jax.Array        # [Kp, Np]  zero-padded, pre-transposed weight
    bias: jax.Array      # [1, Np]   zero-padded bias
    ia3: jax.Array       # [1, Np]   zero-padded IA3 scaling vector
    in_features: int
    out_features: int
    tn: int              # N tile (lane-aligned)
    tk: int              # K tile (lane-aligned)


def prepare_ia3_params(weight, bias, ia3_vector, *, tn=1024, tk=1024,
                       param_dtype=None):
    """Pad / transpose the layer parameters ONCE at load time.

    weight: [out_features, in_features] (nn.Linear layout)
    bias, ia3_vector: [out_features]
    param_dtype: optional cast for the weight (e.g. jnp.bfloat16 for full MXU
                 throughput); bias / ia3 stay in their original dtype and the
                 epilogue runs in f32.
    """
    out_features, in_features = weight.shape
    tn_e = min(tn, _round_up(out_features, 128))       # lane multiple
    tk_e = min(tk, _round_up(in_features, 128))        # lane multiple
    Np = _round_up(out_features, tn_e)
    Kp = _round_up(in_features, tk_e)

    w = weight.astype(param_dtype) if param_dtype is not None else weight
    wT = jnp.pad(w.T, ((0, Kp - in_features), (0, Np - out_features)))
    bp = jnp.pad(bias, (0, Np - out_features)).reshape(1, Np)
    vp = jnp.pad(ia3_vector, (0, Np - out_features)).reshape(1, Np)
    return IA3Params(wT, bp, vp, in_features, out_features, tn_e, tk_e)


# ---------------------------------------------------------------------------
# Kernels
# ---------------------------------------------------------------------------

def _ia3_kernel_single_k(x_ref, wT_ref, b_ref, v_ref, o_ref):
    # Fast path: whole K fits in one tile -> no accumulator scratch, no pl.when.
    acc = jnp.dot(x_ref[...], wT_ref[...], preferred_element_type=jnp.float32)
    out = (acc + b_ref[...].astype(jnp.float32)) * v_ref[...].astype(jnp.float32)
    o_ref[...] = out.astype(o_ref.dtype)


def _ia3_kernel_multi_k(x_ref, wT_ref, b_ref, v_ref, o_ref, acc_ref):
    # x_ref  : [tm, tk], wT_ref: [tk, tn], b_ref/v_ref: [1, tn]
    # acc_ref: [tm, tn] f32, resident across the K grid axis.
    k = pl.program_id(2)
    partial = jnp.dot(x_ref[...], wT_ref[...], preferred_element_type=jnp.float32)

    @pl.when(k == 0)
    def _():
        acc_ref[...] = partial          # overwrite: no zero-init pass needed

    @pl.when(k != 0)
    def _():
        acc_ref[...] = acc_ref[...] + partial

    @pl.when(k == pl.num_programs(2) - 1)
    def _():
        out = (acc_ref[...] + b_ref[...].astype(jnp.float32)) \
              * v_ref[...].astype(jnp.float32)
        o_ref[...] = out.astype(o_ref.dtype)


# ---------------------------------------------------------------------------
# Wrapper
# ---------------------------------------------------------------------------

def ia3_linear(x, params: IA3Params, *, tm=512, compute_dtype=None,
               weight_buffers=None):
    """IA3LinearLayer forward: (x @ W.T + b) * ia3_vector.

    x: [..., in_features]; params: from prepare_ia3_params().
    compute_dtype: optional cast for the activations (e.g. jnp.bfloat16).
    weight_buffers: optional pipeline depth for the weight stream (v5e GEMV-like
                    regime); None keeps the default double buffering.
    """
    out_dtype = x.dtype
    lead_shape = x.shape[:-1]
    in_features = params.in_features
    out_features = params.out_features
    assert x.shape[-1] == in_features

    x2d = x.reshape(-1, in_features)
    if compute_dtype is not None:
        x2d = x2d.astype(compute_dtype)
    M = x2d.shape[0]

    Kp, Np = params.wT.shape
    tn_e = params.tn
    tk_e = params.tk
    tm_e = min(tm, _round_up(max(M, 1), 8))             # sublane multiple
    Mp = _round_up(M, tm_e)

    if Mp != M or Kp != in_features:
        x2d = jnp.pad(x2d, ((0, Mp - M), (0, Kp - in_features)))

    # v7x megacore: make sure the parallel (i, j) grid has >= 2 blocks so both
    # TensorCores get work; prefer splitting N when M is small.
    while (Mp // tm_e) * (Np // tn_e) < 2 and tn_e > 128 and tn_e % 256 == 0:
        tn_e //= 2

    n_i, n_j, n_k = Mp // tm_e, Np // tn_e, Kp // tk_e

    x_b = jnp.dtype(x2d.dtype).itemsize
    w_b = jnp.dtype(params.wT.dtype).itemsize
    b_b = jnp.dtype(params.bias.dtype).itemsize
    o_b = jnp.dtype(out_dtype).itemsize

    w_spec_kwargs = {}
    if weight_buffers is not None:
        w_spec_kwargs["pipeline_mode"] = pl.Buffered(weight_buffers)

    if n_k == 1:
        grid = (n_i, n_j)
        kernel = _ia3_kernel_single_k
        in_specs = [
            pl.BlockSpec((tm_e, Kp), lambda i, j: (i, 0)),                   # x
            pl.BlockSpec((Kp, tn_e), lambda i, j: (0, j), **w_spec_kwargs),  # W.T
            pl.BlockSpec((1, tn_e), lambda i, j: (0, j)),                    # bias
            pl.BlockSpec((1, tn_e), lambda i, j: (0, j)),                    # ia3
        ]
        out_specs = pl.BlockSpec((tm_e, tn_e), lambda i, j: (i, j))
        scratch_shapes = []
        dims = ("parallel", "parallel")
        vmem_need = (2 * (tm_e * Kp * x_b + Kp * tn_e * w_b + 2 * tn_e * b_b)
                     + 2 * tm_e * tn_e * o_b + tm_e * tn_e * 4)
    else:
        grid = (n_i, n_j, n_k)
        kernel = _ia3_kernel_multi_k
        in_specs = [
            pl.BlockSpec((tm_e, tk_e), lambda i, j, k: (i, k)),                   # x
            pl.BlockSpec((tk_e, tn_e), lambda i, j, k: (k, j), **w_spec_kwargs),  # W.T
            pl.BlockSpec((1, tn_e), lambda i, j, k: (0, j)),                      # bias
            pl.BlockSpec((1, tn_e), lambda i, j, k: (0, j)),                      # ia3
        ]
        out_specs = pl.BlockSpec((tm_e, tn_e), lambda i, j, k: (i, j))
        scratch_shapes = [pltpu.VMEM((tm_e, tn_e), jnp.float32)]
        dims = ("parallel", "parallel", "arbitrary")
        vmem_need = (2 * (tm_e * tk_e * x_b + tk_e * tn_e * w_b + 2 * tn_e * b_b)
                     + 2 * tm_e * tn_e * o_b + tm_e * tn_e * 4)

    # Scheduler hint: account for re-streaming (x streamed once per N block,
    # W once per M block under this tiling).
    cost = pl.CostEstimate(
        flops=2 * Mp * Kp * Np,
        transcendentals=0,
        bytes_accessed=(Mp * Kp * x_b * n_j + Kp * Np * w_b * n_i
                        + 2 * Np * b_b * n_i + Mp * Np * o_b),
    )

    vmem_limit = int(max(32 * 1024 * 1024, (vmem_need * 5) // 4))

    out = pl.pallas_call(
        kernel,
        out_shape=jax.ShapeDtypeStruct((Mp, Np), out_dtype),
        grid_spec=pltpu.PrefetchScalarGridSpec(
            num_scalar_prefetch=0,
            grid=grid,
            in_specs=in_specs,
            out_specs=out_specs,
            scratch_shapes=scratch_shapes,
        ),
        compiler_params=pltpu.CompilerParams(
            dimension_semantics=dims,
            vmem_limit_bytes=vmem_limit),
        cost_estimate=cost,
    )(x2d, params.wT, params.bias, params.ia3)

    if Mp != M or Np != out_features:
        out = out[:M, :out_features]
    return out.reshape(*lead_shape, out_features)


if __name__ == "__main__":
    key = jax.random.PRNGKey(0)
    k_x, k_w, k_b, k_x2, k_w2, k_b2 = jax.random.split(key, 6)

    # --- Test 1: IA3LinearLayer demo shapes (single-K fast path) --------------
    batch, seq, in_f, out_f = 2, 8, 32, 32
    x = jax.random.normal(k_x, (batch, seq, in_f), dtype=jnp.float32)
    bound = 1.0 / (in_f ** 0.5)
    weight = jax.random.uniform(k_w, (out_f, in_f),
                                minval=-bound, maxval=bound, dtype=jnp.float32)
    bias = jax.random.uniform(k_b, (out_f,),
                              minval=-bound, maxval=bound, dtype=jnp.float32)
    ia3_vec = jnp.ones((out_f,), dtype=jnp.float32)   # IA3 init is ones

    params = prepare_ia3_params(weight, bias, ia3_vec)   # hoisted pad/transpose
    out = jax.block_until_ready(ia3_linear(x, params))
    ref = (x @ weight.T + bias) * ia3_vec
    assert out.shape == (batch, seq, out_f)
    assert jnp.allclose(out, ref, atol=1e-5, rtol=1e-5)

    # --- Test 2: multi-K accumulator path + parallel-grid split heuristic -----
    in_f2, out_f2 = 384, 256
    x2 = jax.random.normal(k_x2, (batch, seq, in_f2), dtype=jnp.float32)
    bound2 = 1.0 / (in_f2 ** 0.5)
    weight2 = jax.random.uniform(k_w2, (out_f2, in_f2),
                                 minval=-bound2, maxval=bound2, dtype=jnp.float32)
    bias2 = jax.random.uniform(k_b2, (out_f2,),
                               minval=-bound2, maxval=bound2, dtype=jnp.float32)
    ia3_vec2 = jax.random.normal(jax.random.PRNGKey(1), (out_f2,), dtype=jnp.float32)

    params2 = prepare_ia3_params(weight2, bias2, ia3_vec2, tn=256, tk=128)
    out2 = jax.block_until_ready(ia3_linear(x2, params2))
    ref2 = (x2 @ weight2.T + bias2) * ia3_vec2
    assert jnp.allclose(out2, ref2, atol=1e-4, rtol=1e-4)

    # --- Test 3: bf16 compute path (full MXU rate), f32 accumulate/epilogue ---
    params3 = prepare_ia3_params(weight2, bias2, ia3_vec2, tn=256, tk=128,
                                 param_dtype=jnp.bfloat16)
    out3 = jax.block_until_ready(
        ia3_linear(x2, params3, compute_dtype=jnp.bfloat16))
    assert jnp.allclose(out3, ref2, atol=5e-2, rtol=5e-2)

    print("KERNEL_OK")
</pallas_src>

<mosaic_0001>
module attributes {stable_mosaic.version = 11 : i64} {
  func.func @_ia3_kernel_single_k(%arg0: i32, %arg1: i32, %arg2: memref<16x128xf32, #tpu.memory_space<vmem>>, %arg3: memref<128x128xf32, #tpu.memory_space<vmem>>, %arg4: memref<1x128xf32, #tpu.memory_space<vmem>>, %arg5: memref<1x128xf32, #tpu.memory_space<vmem>>, %arg6: memref<16x128xf32, #tpu.memory_space<vmem>>) attributes {dimension_semantics = [#tpu.dimension_semantics<parallel>, #tpu.dimension_semantics<parallel>], iteration_bounds = array<i64: 1, 1>, scalar_prefetch = 0 : i64, scratch_operands = 0 : i64, tpu.core_type = #tpu.core_type<tc>, window_params = [{transform_indices = @transform_0, window_bounds = array<i64: 16, 128>}, {transform_indices = @transform_1, window_bounds = array<i64: 128, 128>}, {transform_indices = @transform_2, window_bounds = array<i64: 1, 128>}, {transform_indices = @transform_3, window_bounds = array<i64: 1, 128>}, {transform_indices = @transform_4, window_bounds = array<i64: 16, 128>}]} {
    %c0 = arith.constant 0 : index
    %c0_0 = arith.constant 0 : index
    %0 = vector.load %arg2[%c0, %c0_0] : memref<16x128xf32, #tpu.memory_space<vmem>>, vector<16x128xf32>
    %c0_1 = arith.constant 0 : index
    %c0_2 = arith.constant 0 : index
    %1 = vector.load %arg3[%c0_1, %c0_2] : memref<128x128xf32, #tpu.memory_space<vmem>>, vector<128x128xf32>
    %cst = arith.constant dense<0.000000e+00> : vector<16x128xf32>
    %2 = tpu.matmul %0, %1, %cst {dimension_numbers = #tpu.dot_dimension_numbers<[1], [0], [0], [1], [0, 0, 1, 1], [], []>} : vector<16x128xf32>, vector<128x128xf32>, vector<16x128xf32> -> vector<16x128xf32>
    %c0_3 = arith.constant 0 : index
    %c0_4 = arith.constant 0 : index
    %3 = vector.load %arg4[%c0_3, %c0_4] : memref<1x128xf32, #tpu.memory_space<vmem>>, vector<1x128xf32>
    %4 = vector.broadcast %3 : vector<1x128xf32> to vector<16x128xf32>
    %5 = arith.addf %2, %4 : vector<16x128xf32>
    %c0_5 = arith.constant 0 : index
    %c0_6 = arith.constant 0 : index
    %6 = vector.load %arg5[%c0_5, %c0_6] : memref<1x128xf32, #tpu.memory_space<vmem>>, vector<1x128xf32>
    %7 = vector.broadcast %6 : vector<1x128xf32> to vector<16x128xf32>
    %8 = arith.mulf %5, %7 : vector<16x128xf32>
    %c0_7 = arith.constant 0 : index
    %c0_8 = arith.constant 0 : index
    %9 = vector.load %arg6[%c0_7, %c0_8] : memref<16x128xf32, #tpu.memory_space<vmem>>, vector<16x128xf32>
    tpu.vector_store %arg6[%c0_7, %c0_8], %8 {strides = array<i32>} : memref<16x128xf32, #tpu.memory_space<vmem>>, vector<16x128xf32>,
    return
  }
  func.func @transform_0(%arg0: i32, %arg1: i32) -> (i32, i32) {
    %c0_i32 = arith.constant 0 : i32
    %c0_i32_0 = arith.constant 0 : i32
    return %arg0, %c0_i32 : i32, i32
  }
  func.func @transform_1(%arg0: i32, %arg1: i32) -> (i32, i32) {
    %c0_i32 = arith.constant 0 : i32
    %c0_i32_0 = arith.constant 0 : i32
    return %c0_i32, %arg1 : i32, i32
  }
  func.func @transform_2(%arg0: i32, %arg1: i32) -> (i32, i32) {
    %c0_i32 = arith.constant 0 : i32
    %c0_i32_0 = arith.constant 0 : i32
    return %c0_i32, %arg1 : i32, i32
  }
  func.func @transform_3(%arg0: i32, %arg1: i32) -> (i32, i32) {
    %c0_i32 = arith.constant 0 : i32
    %c0_i32_0 = arith.constant 0 : i32
    return %c0_i32, %arg1 : i32, i32
  }
  func.func @transform_4(%arg0: i32, %arg1: i32) -> (i32, i32) {
    %c0_i32 = arith.constant 0 : i32
    return %arg0, %arg1 : i32, i32
  }
}

</mosaic_0001>

<bundles_post_ra>
// kernel: tpu_custom_call.1
= control target key start
LH: loop header
LB: loop body
LE: loop exit
PB: predicated region body
PF: predicated region fallthrough
CT: control target
= control target key end

     0   :  { %9 = vsyncpa [#allocation3], 0  ;;  %s278_s0 = inlined_call_operand.hbm [shape: f32[16,128], index: 0, kind: input, shape index: {}]   ;;  %s279_s1 = inlined_call_operand.hbm [shape: f32[128,128], index: 1, kind: input, shape index: {}]   ;;  %s280_s2 = inlined_call_operand.vmem [shape: f32[1,128], index: 2, kind: input, shape index: {}]   ;;  %s281_s3 = inlined_call_operand.vmem [shape: f32[1,128], index: 3, kind: input, shape index: {}]   ;;  %s282_s4 = inlined_call_operand.hbm [shape: f32[16,128], index: 4, kind: output, shape index: {}]  }
   0x1   :  { %10 = vsyncpa [#allocation6], 0 }
   0x2   :  { %11 = vsyncpa [#allocation4], 0  ;;  %s16_s17 = sshll.u32 %s278_s0, 4  ;;  %s224_s18 = smov [#allocation2]   ;;  %s17_s17 = int_to_ptr.hbm [resolvable:$true] %s16_s17 }
   0x3   :  { %s18_s19 = sshll.u32 %s224_s18, 4  ;;  %s29_s22 = sshll.u32 %s279_s1, 4  ;;  %s19_s19 = int_to_ptr.vmem [resolvable:$true] %s18_s19  ;;  %s30_s22 = int_to_ptr.hbm [resolvable:$true] %s29_s22 }
   0x4   :  { %s225_s23 = smov 128   ;;  %s226_s24 = smov 8  }
   0x5   :  { %24 = dma.hbm_to_vmem [thread:$0]  %s17_s17, 256, %s19_s19, [#allocation3], %s225_s23, %s225_s23, %s226_s24  }
   0x6   :  { %s227_s25 = smov [#allocation5]  }
   0x7   :  { %s31_s26 = sshll.u32 %s227_s25, 4  ;;  %s32_s26 = int_to_ptr.vmem [resolvable:$true] %s31_s26 }
   0x8   :  { %37 = dma.hbm_to_vmem [thread:$0]  %s30_s22, 2048, %s32_s26, [#allocation6], %s225_s23, %s225_s23, %s226_s24  }
   0x9   :  { %218 = dma.done.wait [#allocation3], 256  }
   0xa   :  { %219 = vsyncadd [#allocation3], 4294967040 }
   0xb   :  { %220 = dma.done.wait [#allocation6], 2048  }
   0xc   :  { %221 = vsyncadd [#allocation6], 4294965248  ;;  %v67_v0 = vld [vmem:[#allocation5 + $0x78] sm:$0xff]  ;;  %v66_v1 = vld [vmem:[#allocation5 + $0x70] sm:$0xff]  ;;  %s228_s29 = smov [#allocation7]   ;;  %s109_s7 = sshll.u32 %s282_s4, 4  ;;  %s110_s7 = int_to_ptr.hbm [resolvable:$true] %s109_s7 }
   0xd   :  { %72 = vmatpush.msra.mxu0 %v67_v0  ;;  %123 = vmatpush.msra.mxu1 %v67_v0  ;;  %v65_v2 = vld [vmem:[#allocation5 + $0x68] sm:$0xff]  ;;  %v64_v3 = vld [vmem:[#allocation5 + $0x60] sm:$0xff]  ;;  %v63_v4 = vld [vmem:[#allocation5 + $0x58] sm:$0xff]  ;;  %s107_s30 = sshll.u32 %s228_s29, 4  ;;  %s108_s30 = int_to_ptr.vmem [resolvable:$true] %s107_s30 }
   0xe   :  { %v62_v5 = vld [vmem:[#allocation5 + $0x50] sm:$0xff]  ;;  %v61_v6 = vld [vmem:[#allocation5 + $0x48] sm:$0xff]  ;;  %v60_v7 = vld [vmem:[#allocation5 + $0x40] sm:$0xff] }
   0xf   :  { %73 = vmatpush.msra.mxu0 %v66_v1  ;;  %124 = vmatpush.msra.mxu1 %v66_v1  ;;  %v59_v8 = vld [vmem:[#allocation5 + $0x38] sm:$0xff]  ;;  %v58_v9 = vld [vmem:[#allocation5 + $0x30] sm:$0xff]  ;;  %v57_v10 = vld [vmem:[#allocation5 + $0x28] sm:$0xff] }
  0x10   :  { %v56_v11 = vld [vmem:[#allocation5 + $0x20] sm:$0xff]  ;;  %v55_v12 = vld [vmem:[#allocation5 + $0x18] sm:$0xff]  ;;  %v54_v13 = vld [vmem:[#allocation5 + $0x10] sm:$0xff] }
  0x11   :  { %74 = vmatpush.msra.mxu0 %v65_v2  ;;  %125 = vmatpush.msra.mxu1 %v65_v2  ;;  %v53_v14 = vld [vmem:[#allocation5 + $0x8] sm:$0xff]  ;;  %v52_v15 = vld [vmem:[#allocation5] sm:$0xff]  ;;  %v50_v16 = vld [vmem:[#allocation2] sm:$0xff] }
  0x12   :  { %v51_v17 = vld [vmem:[#allocation2 + $0x8] sm:$0xff]  ;;  %v144_v18 = vld [vmem:[%s280_s2] ss:$0 sm:$0xff] }
  0x13   :  { %75 = vmatpush.msra.mxu0 %v64_v3  ;;  %126 = vmatpush.msra.mxu1 %v64_v3  ;;  %v145_v19 = vld [vmem:[%s281_s3] ss:$0 sm:$0xff] }
  0x15   :  { %76 = vmatpush.msra.mxu0 %v63_v4  ;;  %127 = vmatpush.msra.mxu1 %v63_v4 }
  0x17   :  { %77 = vmatpush.msra.mxu0 %v62_v5  ;;  %128 = vmatpush.msra.mxu1 %v62_v5 }
  0x19   :  { %78 = vmatpush.msra.mxu0 %v61_v6  ;;  %129 = vmatpush.msra.mxu1 %v61_v6 }
  0x1b   :  { %79 = vmatpush.msra.mxu0 %v60_v7  ;;  %130 = vmatpush.msra.mxu1 %v60_v7 }
  0x1d   :  { %80 = vmatpush.msra.mxu0 %v59_v8  ;;  %131 = vmatpush.msra.mxu1 %v59_v8 }
  0x1f   :  { %81 = vmatpush.msra.mxu0 %v58_v9  ;;  %132 = vmatpush.msra.mxu1 %v58_v9 }
  0x21   :  { %82 = vmatpush.msra.mxu0 %v57_v10  ;;  %133 = vmatpush.msra.mxu1 %v57_v10 }
  0x23   :  { %83 = vmatpush.msra.mxu0 %v56_v11  ;;  %134 = vmatpush.msra.mxu1 %v56_v11 }
  0x25   :  { %84 = vmatpush.msra.mxu0 %v55_v12  ;;  %135 = vmatpush.msra.mxu1 %v55_v12 }
  0x27   :  { %85 = vmatpush.msra.mxu0 %v54_v13  ;;  %136 = vmatpush.msra.mxu1 %v54_v13 }
  0x29   :  { %86 = vmatpush.msra.mxu0 %v53_v14  ;;  %137 = vmatpush.msra.mxu1 %v53_v14 }
  0x2b   :  { %87 = vmatpush.msra.mxu0 %v52_v15  ;;  %138 = vmatpush.msra.mxu1 %v52_v15 }
  0x2c   :  { %88 = vmatmul.f32.vlgmr.msra.gmra.mxu0 %v50_v16  ;;  %91 = vmatmul.f32.vlgmr.msra.gmra.mxu1 %v51_v17 }
  0xa9   :  { %v89_v20 = vpop.f32.mrf.mxu0  ;;  %v92_v21 = vpop.f32.mrf.mxu1 }
  0xaa   :  { %v90_v22 = vadd.f32 %v144_v18, %v89_v20  ;;  %v93_v23 = vadd.f32 %v144_v18, %v92_v21 }
  0xac   :  { %v99_v24 = vmul.f32 %v145_v19, %v90_v22  ;;  %v100_v25 = vmul.f32 %v145_v19, %v93_v23 }
  0xae   :  { %101 = vst [vmem:[#allocation7] sm:$0xff] %v99_v24 }
  0xaf   :  { %102 = vst [vmem:[#allocation7 + $0x8] sm:$0xff] %v100_v25 }
  0xb0   :  { %115 = dma.vmem_to_hbm [thread:$0]  %s108_s30, 256, %s110_s7, [#allocation4], %s225_s23, %s225_s23, %s226_s24  }
  0xb1   :  { %222 = dma.done.wait [#allocation4], 256  }
  0xb2   :  { %223 = vsyncadd [#allocation4], 4294967040 }
  0xb3   :  { %120 = vsyncpa [#allocation3], 1 }
  0xb4   :  { %121 = vsyncpa [#allocation6], 1 }
  0xb5   :  { %122 = vsyncpa [#allocation4], 1 }

</bundles_post_ra>
